<compile_context>
chip_gen: v7x
topology: tpu7x:2x2x1
jax: 0.10.0
libtpu: 0.0.40
codegen_flags: <defaults>
</compile_context>

<pallas_src>
import jax
import jax.numpy as jnp
from jax.experimental import pallas as pl
from jax.experimental.pallas import tpu as pltpu


def _round_up(x, m):
    return ((x + m - 1) // m) * m


def _classify_head_kernel(x_ref, w_ref, b_ref, out_ref, acc_ref):
    # x_ref:  (TN, C, TS)  input dtype (f32 or bf16)
    # w_ref:  (C, Kp)      f32, mean scale 1/(H*W) already folded in
    # b_ref:  (1, Kp)      f32
    # out_ref:(TN, Kp)     f32
    # acc_ref:(TN, C)      f32 scratch (pooled-sum accumulator)
    s = pl.program_id(1)

    @pl.when(s == 0)
    def _():
        acc_ref[...] = jnp.zeros_like(acc_ref)

    # Accumulate raw spatial sums in f32 (precision-safe for bf16 inputs).
    x = x_ref[...].astype(jnp.float32)
    acc_ref[...] += jnp.sum(x, axis=-1)

    @pl.when(s == pl.num_programs(1) - 1)
    def _():
        logits = jnp.dot(acc_ref[...], w_ref[...],
                         preferred_element_type=jnp.float32) + b_ref[...]
        out_ref[...] = jax.nn.sigmoid(logits)   # default loss -> sigmoid


def classify_head_forward(raw_feature_nchw, w_t, b,
                          *, target_tile_bytes=4 * 1024 * 1024):
    """raw_feature_nchw: (N, C, H, W) (f32 or bf16); w_t: (C, K) transposed
    Linear weight; b: (K,) bias. Returns (outputs, loss) like the PyTorch
    module with targets=None."""
    N, C, H, W = raw_feature_nchw.shape
    Cw, K = w_t.shape
    assert Cw == C
    S = H * W
    x = raw_feature_nchw.reshape(N, C, S)
    itemsize = jnp.dtype(x.dtype).itemsize

    # --- spatial tiling: lane-dense (multiple of 128), large blocks ---------
    s128 = _round_up(S, 128)
    TS = s128 if s128 <= 2048 else 1024
    S_pad = _round_up(S, TS)

    # --- N tiling: keep one x tile around target_tile_bytes ----------------
    row_bytes = C * TS * itemsize
    TN = max(1, target_tile_bytes // row_bytes)
    if TN >= N:
        TN = N
        N_pad = N
    else:
        TN = max(8, (TN // 8) * 8)          # block dim must be 8-aligned
        N_pad = _round_up(N, TN)

    # --- lane-dense output width --------------------------------------------
    Kp = _round_up(K, 128)

    # --- pad inputs (zeros do not perturb the pooled sum) -------------------
    if N_pad != N or S_pad != S:
        x = jnp.pad(x, ((0, N_pad - N), (0, 0), (0, S_pad - S)))
    # Fold the 1/(H*W) mean scale into the weight once (O(C*K) instead of
    # per-tile rescaling) and pad K to the lane-dense width.
    w_scaled = w_t.astype(jnp.float32) / float(S)
    w_pad = jnp.pad(w_scaled, ((0, 0), (0, Kp - K)))
    b_pad = jnp.pad(b.astype(jnp.float32), ((0, Kp - K),)).reshape(1, Kp)

    grid = (N_pad // TN, S_pad // TS)

    cost = pl.CostEstimate(
        flops=N_pad * C * S_pad + 2 * N_pad * C * Kp,
        transcendentals=N_pad * Kp,
        bytes_accessed=(N_pad * C * S_pad * itemsize
                        + C * Kp * 4 + Kp * 4 + N_pad * Kp * 4),
    )

    out = pl.pallas_call(
        _classify_head_kernel,
        out_shape=jax.ShapeDtypeStruct((N_pad, Kp), jnp.float32),
        grid_spec=pltpu.PrefetchScalarGridSpec(
            num_scalar_prefetch=0,
            grid=grid,
            in_specs=[
                pl.BlockSpec((TN, C, TS), lambda n, s: (n, 0, s)),
                pl.BlockSpec((C, Kp), lambda n, s: (0, 0)),
                pl.BlockSpec((1, Kp), lambda n, s: (0, 0)),
            ],
            out_specs=pl.BlockSpec((TN, Kp), lambda n, s: (n, 0)),
            scratch_shapes=[pltpu.VMEM((TN, C), jnp.float32)],
        ),
        compiler_params=pltpu.CompilerParams(
            dimension_semantics=("parallel", "arbitrary"),
            vmem_limit_bytes=48 << 20,
        ),
        cost_estimate=cost,
    )(x, w_pad, b_pad)

    # Slice off padded rows/columns (padded K cols hold sigmoid(0)=0.5 garbage).
    outputs = out[:N, :K]

    # TODO(synk): training-time loss path (BCE-with-logits * valid mask) needs
    # targets; forward(targets=None) returns loss=None, which we match here.
    loss = None
    return outputs, loss


def _reference(x_nchw, w_t, b):
    N, C, H, W = x_nchw.shape
    feats = jnp.mean(x_nchw.astype(jnp.float32).reshape(N, C, H * W), axis=-1)
    return jax.nn.sigmoid(feats @ w_t.astype(jnp.float32) + b.astype(jnp.float32))


if __name__ == "__main__":
    key = jax.random.PRNGKey(0)
    k_x, k_w, k_b, k_x2 = jax.random.split(key, 4)

    # Small shapes consistent with the module: batch=2, channels=4, spatial=16,
    # num_outputs (categories) = 8.
    N, C, H, W, K = 2, 4, 16, 16, 8

    x = jax.random.normal(k_x, (N, C, H, W), dtype=jnp.float32)
    # PyTorch stores Linear weight as (K, C); kernel takes the transpose (C, K).
    w_t = jax.random.normal(k_w, (C, K), dtype=jnp.float32) * 0.1
    b = jax.random.normal(k_b, (K,), dtype=jnp.float32) * 0.1

    outputs, loss = classify_head_forward(x, w_t, b)
    outputs = jax.block_until_ready(outputs)

    outputs_ref = _reference(x, w_t, b)
    assert outputs.shape == (N, K)
    assert loss is None
    assert jnp.allclose(outputs, outputs_ref, atol=1e-5, rtol=1e-5)

    # Second check exercising the N/spatial/K padding path (odd spatial size).
    x2 = jax.random.normal(k_x2, (3, C, 5, 5), dtype=jnp.float32)
    outputs2, _ = classify_head_forward(x2, w_t, b)
    outputs2 = jax.block_until_ready(outputs2)
    outputs2_ref = _reference(x2, w_t, b)
    assert outputs2.shape == (3, K)
    assert jnp.allclose(outputs2, outputs2_ref, atol=1e-5, rtol=1e-5)

    print("KERNEL_OK")
</pallas_src>

<mosaic_0001>
module attributes {stable_mosaic.version = 11 : i64} {
  func.func @_classify_head_kernel(%arg0: i32, %arg1: i32, %arg2: memref<2x4x256xf32, #tpu.memory_space<vmem>>, %arg3: memref<4x128xf32, #tpu.memory_space<vmem>>, %arg4: memref<1x128xf32, #tpu.memory_space<vmem>>, %arg5: memref<2x128xf32, #tpu.memory_space<vmem>>, %arg6: memref<2x4xf32, #tpu.memory_space<vmem>>) attributes {dimension_semantics = [#tpu.dimension_semantics<parallel>, #tpu.dimension_semantics<arbitrary>], iteration_bounds = array<i64: 1, 1>, scalar_prefetch = 0 : i64, scratch_operands = 1 : i64, tpu.core_type = #tpu.core_type<tc>, window_params = [{transform_indices = @transform_0, window_bounds = array<i64: 2, 4, 256>}, {pipeline_mode = #tpu.pipeline_mode<synchronous>, transform_indices = @transform_1, window_bounds = array<i64: 4, 128>}, {pipeline_mode = #tpu.pipeline_mode<synchronous>, transform_indices = @transform_2, window_bounds = array<i64: 1, 128>}, {transform_indices = @transform_3, window_bounds = array<i64: 2, 128>}]} {
    %c0_i32 = arith.constant 0 : i32
    %0 = arith.cmpi eq, %arg1, %c0_i32 : i32
    %1 = arith.extui %0 : i1 to i32
    %c0_i32_0 = arith.constant 0 : i32
    %2 = arith.cmpi ne, %1, %c0_i32_0 : i32
    scf.if %2 {
      %cst_9 = arith.constant 0.000000e+00 : f32
      %11 = vector.broadcast %cst_9 : f32 to vector<2x4xf32>
      %c0_10 = arith.constant 0 : index
      %c0_11 = arith.constant 0 : index
      %12 = vector.load %arg6[%c0_10, %c0_11] : memref<2x4xf32, #tpu.memory_space<vmem>>, vector<2x4xf32>
      tpu.vector_store %arg6[%c0_10, %c0_11], %11 {strides = array<i32>} : memref<2x4xf32, #tpu.memory_space<vmem>>, vector<2x4xf32>,
    } else {
    }
    %c0 = arith.constant 0 : index
    %c0_1 = arith.constant 0 : index
    %c0_2 = arith.constant 0 : index
    %3 = vector.load %arg2[%c0, %c0_1, %c0_2] : memref<2x4x256xf32, #tpu.memory_space<vmem>>, vector<2x4x256xf32>
    %c0_3 = arith.constant 0 : index
    %c0_4 = arith.constant 0 : index
    %4 = vector.load %arg6[%c0_3, %c0_4] : memref<2x4xf32, #tpu.memory_space<vmem>>, vector<2x4xf32>
    %cst = arith.constant dense<0.000000e+00> : vector<2x4xf32>
    %5 = vector.multi_reduction <add>, %3, %cst [2] : vector<2x4x256xf32> to vector<2x4xf32>
    %6 = arith.addf %4, %5 : vector<2x4xf32>
    %c0_5 = arith.constant 0 : index
    %c0_6 = arith.constant 0 : index
    %7 = vector.load %arg6[%c0_5, %c0_6] : memref<2x4xf32, #tpu.memory_space<vmem>>, vector<2x4xf32>
    tpu.vector_store %arg6[%c0_5, %c0_6], %6 {strides = array<i32>} : memref<2x4xf32, #tpu.memory_space<vmem>>, vector<2x4xf32>,
    %c0_i32_7 = arith.constant 0 : i32
    %8 = arith.cmpi eq, %arg1, %c0_i32_7 : i32
    %9 = arith.extui %8 : i1 to i32
    %c0_i32_8 = arith.constant 0 : i32
    %10 = arith.cmpi ne, %9, %c0_i32_8 : i32
    scf.if %10 {
      %c0_9 = arith.constant 0 : index
      %c0_10 = arith.constant 0 : index
      %11 = vector.load %arg6[%c0_9, %c0_10] : memref<2x4xf32, #tpu.memory_space<vmem>>, vector<2x4xf32>
      %c0_11 = arith.constant 0 : index
      %c0_12 = arith.constant 0 : index
      %12 = vector.load %arg3[%c0_11, %c0_12] : memref<4x128xf32, #tpu.memory_space<vmem>>, vector<4x128xf32>
      %cst_13 = arith.constant dense<0.000000e+00> : vector<2x128xf32>
      %13 = tpu.matmul %11, %12, %cst_13 {dimension_numbers = #tpu.dot_dimension_numbers<[1], [0], [0], [1], [0, 0, 1, 1], [], []>} : vector<2x4xf32>, vector<4x128xf32>, vector<2x128xf32> -> vector<2x128xf32>
      %c0_14 = arith.constant 0 : index
      %c0_15 = arith.constant 0 : index
      %14 = vector.load %arg4[%c0_14, %c0_15] : memref<1x128xf32, #tpu.memory_space<vmem>>, vector<1x128xf32>
      %15 = vector.broadcast %14 : vector<1x128xf32> to vector<2x128xf32>
      %16 = arith.addf %13, %15 : vector<2x128xf32>
      %17 = arith.negf %16 : vector<2x128xf32>
      %18 = math.exp %17 : vector<2x128xf32>
      %cst_16 = arith.constant 1.000000e+00 : f32
      %19 = vector.broadcast %cst_16 : f32 to vector<2x128xf32>
      %20 = arith.addf %19, %18 : vector<2x128xf32>
      %21 = arith.divf %19, %20 : vector<2x128xf32>
      %c0_17 = arith.constant 0 : index
      %c0_18 = arith.constant 0 : index
      %22 = vector.load %arg5[%c0_17, %c0_18] : memref<2x128xf32, #tpu.memory_space<vmem>>, vector<2x128xf32>
      tpu.vector_store %arg5[%c0_17, %c0_18], %21 {strides = array<i32>} : memref<2x128xf32, #tpu.memory_space<vmem>>, vector<2x128xf32>,
    } else {
    }
    return
  }
  func.func @transform_0(%arg0: i32, %arg1: i32) -> (i32, i32, i32) {
    %c0_i32 = arith.constant 0 : i32
    %c0_i32_0 = arith.constant 0 : i32
    return %arg0, %c0_i32, %arg1 : i32, i32, i32
  }
  func.func @transform_1(%arg0: i32, %arg1: i32) -> (i32, i32) {
    %c0_i32 = arith.constant 0 : i32
    %c0_i32_0 = arith.constant 0 : i32
    %c0_i32_1 = arith.constant 0 : i32
    return %c0_i32, %c0_i32_0 : i32, i32
  }
  func.func @transform_2(%arg0: i32, %arg1: i32) -> (i32, i32) {
    %c0_i32 = arith.constant 0 : i32
    %c0_i32_0 = arith.constant 0 : i32
    %c0_i32_1 = arith.constant 0 : i32
    return %c0_i32, %c0_i32_0 : i32, i32
  }
  func.func @transform_3(%arg0: i32, %arg1: i32) -> (i32, i32) {
    %c0_i32 = arith.constant 0 : i32
    %c0_i32_0 = arith.constant 0 : i32
    return %arg0, %c0_i32 : i32, i32
  }
}

</mosaic_0001>

<bundles_post_ra>
// kernel: tpu_custom_call.1
= control target key start
LH: loop header
LB: loop body
LE: loop exit
PB: predicated region body
PF: predicated region fallthrough
CT: control target
= control target key end

     0   :  { %8 = vsyncpa [#allocation4], 0  ;;  %s366_s0 = inlined_call_operand.hbm [shape: f32[2,4,256], index: 0, kind: input, shape index: {}]   ;;  %s367_s1 = inlined_call_operand.hbm [shape: f32[4,128], index: 1, kind: input, shape index: {}]   ;;  %s368_s2 = inlined_call_operand.vmem [shape: f32[1,128], index: 2, kind: input, shape index: {}]   ;;  %s369_s3 = inlined_call_operand.hbm [shape: f32[2,128], index: 3, kind: output, shape index: {}]  }
   0x1   :  { %9 = vsyncpa [#allocation7], 0 }
   0x2   :  { %10 = vsyncpa [#allocation5], 0  ;;  %s293_s12 = smov [#allocation3]   ;;  %s221_s16 = scalar_lea.hbm %s366_s0, 256 }
   0x3   :  { %s16_s13 = sshll.u32 %s293_s12, 4  ;;  %p222_p0 = scmp.ne.s32.totalorder %s366_s0, %s221_s16  ;;  %s17_s13 = int_to_ptr.vmem [resolvable:$true] %s16_s13 }
   0x4   :  { %p225_p1 = scmp.lt.u32.totalorder %s221_s16, %s366_s0 }
   0x6   :  { %p227_p2 = pnand %p225_p1, %p222_p0 }
   0x8   :  { %230 = shalt.err (!%p227_p2)
}
   0x9   :  { %s231_s21 = scalar_lea.vmem %s17_s13, 256  ;;  %p236_p4 = scmp.lt.s32.totalorder %s17_s13, %s17_s13 }
   0xa   :  { %p232_p3 = scmp.ne.s32.totalorder %s17_s13, %s231_s21  ;;  %p237_p5 = scmp.lt.s32.totalorder %s231_s21, %s231_s21 }
   0xc   :  { %p238_p6 = por %p237_p5, %p236_p4 }
   0xe   :  { %p239_p7 = pnand %p238_p6, %p232_p3 }
  0x10   :  { %242 = shalt.err (!%p239_p7)
}
  0x11   :  { %s294_s22 = smov 128   ;;  %s295_s23 = smov 8  }
  0x12   :  { %22 = dma.hbm_to_vmem [thread:$0]  %s366_s0, 256, %s17_s13, [#allocation4], %s294_s22, %s294_s22, %s295_s23  }
  0x13   :  { %s296_s26 = smov [#allocation6]   ;;  %s243_s30 = scalar_lea.hbm %s367_s1, 64 }
  0x14   :  { %s29_s27 = sshll.u32 %s296_s26, 4  ;;  %p244_p8 = scmp.ne.s32.totalorder %s367_s1, %s243_s30  ;;  %s30_s27 = int_to_ptr.vmem [resolvable:$true] %s29_s27 }
  0x15   :  { %p247_p9 = scmp.lt.u32.totalorder %s243_s30, %s367_s1 }
  0x17   :  { %p249_p10 = pnand %p247_p9, %p244_p8 }
  0x19   :  { %252 = shalt.err (!%p249_p10)
}
  0x1a   :  { %s253_s8 = scalar_lea.vmem %s30_s27, 64  ;;  %p258_p12 = scmp.lt.s32.totalorder %s30_s27, %s30_s27 }
  0x1b   :  { %p254_p11 = scmp.ne.s32.totalorder %s30_s27, %s253_s8  ;;  %p259_p13 = scmp.lt.s32.totalorder %s253_s8, %s253_s8 }
  0x1d   :  { %p260_p0 = por %p259_p13, %p258_p12 }
  0x1f   :  { %p261_p1 = pnand %p260_p0, %p254_p11 }
  0x21   :  { %264 = shalt.err (!%p261_p1)
}
  0x22   :  { %32 = dma.hbm_to_vmem [thread:$0]  %s367_s1, 64, %s30_s27, [#allocation7]  }
  0x23   :  { %287 = dma.done.wait [#allocation4], 256  }
  0x24   :  { %288 = vsyncadd [#allocation4], 4294967040 }
  0x25   :  { %289 = dma.done.wait [#allocation7], 64  }
  0x26   :  { %290 = vsyncadd [#allocation7], 4294967232  ;;  %vm56_vm0 = vcmask 1043456   ;;  %v47_v0 = vld [vmem:[#allocation3] sm:$0xff]  ;;  %v48_v1 = vld [vmem:[#allocation3 + $0x8] sm:$0xff]  ;;  %vm45_vm1 = vcmask 25600   ;;  %v69_v12 = vlaneseq }
  0x27   :  { %v52_v2 = vcombine.high %v47_v0, %v47_v0  ;;  %v57_v3 = vsel %vm56_vm0, %v47_v0, 0.0  ;;  %v53_v4 = vcombine.high %v48_v1, %v48_v1  ;;  %v62_v6 = vsel %vm56_vm0, %v48_v1, 0.0  ;;  %v89_v11 = vld [vmem:[#allocation6] sm:$0xf]  ;;  %v197_v24 = vld [vmem:[%s368_s2] ss:$0 sm:$0xff] }
  0x28   :  { %v297_v10 = vmov 0.0   ;;  %vm298_vm2 = vmmov 0   ;;  %v70_v13 = vand.u32 127, %v69_v12  ;;  %v72_v14 = vshrl.u32 %v69_v12, 7  ;;  %s299_s11 = smov [#allocation8]  }
  0x29   :  { %v58_v5 = vsel %vm56_vm0, %v52_v2, 0.0  ;;  %v63_v7 = vsel %vm56_vm0, %v53_v4, 0.0  ;;  %46 = vst.msk [vmem:[#allocation2] sm:$0x3] %vm45_vm1, %v297_v10  ;;  %203 = vmatprep.subr.mxu0 %v297_v10  ;;  %205 = vmatprep.mubr.msk.f32.mxu0 %vm298_vm2, %v297_v10  ;;  %vm79_vm3 = vcmask 1041409   ;;  %vm97_vm4 = vcmask 31744  }
  0x2a   :  { %v59_v8 = vadd.f32 %v58_v5, %v57_v3  ;;  %v64_v9 = vadd.f32 %v63_v7, %v62_v6  ;;  %204 = vmatpush3.msk.msra.mxu0 %vm56_vm0, %v89_v11  ;;  %v73_v16 = vsub.s32 %v70_v13, %v72_v14  ;;  %s187_s12 = sshll.u32 %s299_s11, 4  ;;  %s188_s12 = int_to_ptr.vmem [resolvable:$true] %s187_s12 }
  0x2b   :  { %s265_s13 = scalar_lea.vmem %s188_s12, 32  ;;  %p270_p3 = scmp.lt.s32.totalorder %s188_s12, %s188_s12 }
  0x2c   :  { %60 = vadd.xlane.f32.xlu0 %v59_v8  ;;  %p266_p2 = scmp.ne.s32.totalorder %s188_s12, %s265_s13  ;;  %p271_p4 = scmp.lt.s32.totalorder %s265_s13, %s265_s13 }
  0x2e   :  { %p272_p5 = por %p271_p4, %p270_p3 }
  0x30   :  { %65 = vadd.xlane.f32.xlu0 %v64_v9  ;;  %v49_v20 = vld [vmem:[#allocation2] sm:$0x3]  ;;  %p273_p6 = pnand %p272_p5, %p266_p2 }
  0xb9   :  { %v61_v15 = vpop.xlane.xlu0 %60 }
  0xba   :  { %v74_v18 = vrot.slane %v61_v15, %v73_v16 }
  0xbd   :  { %v66_v17 = vpop.xlane.xlu0 %65 }
  0xbe   :  { %v78_v19 = vrot.slane %v66_v17, %v73_v16 }
  0xc0   :  { %v80_v21 = vsel %vm79_vm3, %v78_v19, %v74_v18 }
  0xc1   :  { %v82_v22 = vadd.f32 %v80_v21, %v49_v20 }
  0xc3   :  { %84 = vst.msk [vmem:[#allocation2] sm:$0x3] %vm45_vm1, %v82_v22 }
  0xca   :  { %v88_v23 = vld [vmem:[#allocation2] sm:$0x3] }
  0xcb   :  { %206 = vmatmul.mubr.msk.f32.vlgmr.msra.gmra.mrb[0].mxu0 %vm97_vm4, %v88_v23 }
 0x19e   :  { %v170_v25 = vpop.f32.mrb[0].mxu0 }
 0x19f   :  { %v171_v26 = vadd.f32 %v197_v24, %v170_v25  ;;  %v207_v27 = vpop.f32.mrb[1].mxu0 }
 0x1a1   :  { %v200_v28 = vmul.f32 -1.442695, %v171_v26 }
 0x1a3   :  { %217 = vpow2.f32 %v200_v28 }
 0x1ad   :  { %v218_v29 = vpop.eup %217 }
 0x1ae   :  { %v177_v30 = vadd.f32 1.0, %v218_v29 }
 0x1b0   :  { %219 = vrcp.f32 %v177_v30 }
 0x1ba   :  { %v220_v31 = vpop.eup %219 }
 0x1bb   :  { %180 = vst [vmem:[#allocation8] sm:$0x3] %v220_v31 }
 0x1bc   :  { %276 = shalt.err (!%p273_p6)
}
 0x1bd   :  { %s277_s15 = scalar_lea.hbm %s369_s3, 32 }
 0x1be   :  { %p278_p7 = scmp.ne.s32.totalorder %s369_s3, %s277_s15  ;;  %p281_p8 = scmp.lt.u32.totalorder %s277_s15, %s369_s3 }
 0x1c0   :  { %p283_p9 = pnand %p281_p8, %p278_p7 }
 0x1c2   :  { %286 = shalt.err (!%p283_p9)
}
 0x1c3   :  { %190 = dma.vmem_to_hbm [thread:$0]  %s188_s12, 32, %s369_s3, [#allocation5]  }
 0x1c4   :  { %291 = dma.done.wait [#allocation5], 32  }
 0x1c5   :  { %292 = vsyncadd [#allocation5], 4294967264 }
 0x1c6   :  { %194 = vsyncpa [#allocation4], 1 }
 0x1c7   :  { %195 = vsyncpa [#allocation7], 1 }
 0x1c8   :  { %196 = vsyncpa [#allocation5], 1 }

</bundles_post_ra>
